<compile_context>
chip_gen: v6e
topology: v6e:2x2x1
jax: 0.10.0
libtpu: 0.0.40
codegen_flags: <defaults>
</compile_context>

<pallas_src>
import functools

import jax
import jax.numpy as jnp
from jax.experimental import pallas as pl
from jax.experimental.pallas import tpu as pltpu


# --------------------------------------------------------------- kernels ----

def _masked_kernel(x_ref, m_ref, w_ref, o_ref, acc_ref):
    # x_ref: (TB, TS, D)  activations, native dtype
    # m_ref: (TB, TS)     f32, lane-dense, already mask / mask.sum
    # w_ref: (D, P)       linear weight (W.T), grid-invariant
    # o_ref: (1, TB, P)   lane/sublane-dense output slab
    # acc_ref: (TB, D)    f32 accumulator across sequence chunks
    s = pl.program_id(1)

    @pl.when(s == 0)
    def _init():
        acc_ref[...] = jnp.zeros_like(acc_ref)

    x = x_ref[...]
    m = m_ref[...]                                      # (TB, TS) f32
    acc_ref[...] += jnp.sum(x * m[:, :, None], axis=1)  # (TB, D) f32 accumulation

    @pl.when(s == pl.num_programs(1) - 1)
    def _finalize():
        pooled = acc_ref[...]
        out = jnp.dot(pooled.astype(w_ref.dtype), w_ref[...],
                      preferred_element_type=jnp.float32)  # (TB, P) on the MXU
        o_ref[0] = out.astype(o_ref.dtype)


def _nomask_kernel(x_ref, w_ref, o_ref, acc_ref, *, inv_s):
    # Plain mean over the sequence; 1/S is a compile-time constant.
    s = pl.program_id(1)

    @pl.when(s == 0)
    def _init():
        acc_ref[...] = jnp.zeros_like(acc_ref)

    acc_ref[...] += jnp.sum(x_ref[...], axis=1, dtype=jnp.float32)

    @pl.when(s == pl.num_programs(1) - 1)
    def _finalize():
        pooled = acc_ref[...] * inv_s
        out = jnp.dot(pooled.astype(w_ref.dtype), w_ref[...],
                      preferred_element_type=jnp.float32)
        o_ref[0] = out.astype(o_ref.dtype)


# ----------------------------------------------------------- tile planning --

def _vmem_capacity_bytes():
    try:
        return int(pltpu.get_tpu_info().vmem_capacity_bytes)
    except Exception:
        return 64 << 20   # conservative floor (v7x per-TensorCore VMEM)


def _choose_batch_tile(B, cap=128):
    """Batch rows per grid step.

    Constraints / preferences:
      * TB % 8 == 0 (sublane-dense mask block / output slab / accumulator) or
        TB == B (full-dim blocks trivially satisfy layout constraints),
      * >= 2 batch blocks when possible so the "parallel" axis can be sharded
        across v7x's two TensorCores,
      * prefer a divisor of B so no tail call is needed.
    """
    if B <= 8:
        return B
    best = 0
    for d in range(8, min(cap, max(8, B // 2)) + 1, 8):
        if B % d == 0:
            best = d
    if best:
        return best
    if B <= 2 * cap:                     # small awkward batch: one full block
        return B
    return min(cap, max(8, (B // 2) // 8 * 8))   # tail handled by a 2nd call


def _choose_seq_tile(S, ts_budget):
    """Sequence rows per grid step: the whole sequence, or a chunk that is a
    multiple of 128 (keeps the lane-dense 2-D mask block aligned) and divides S
    (so no partially-valid block ever reaches the accumulator)."""
    if ts_budget >= S or S < 256:
        return S
    best = 0
    for t in range(128, S + 1, 128):
        if S % t:
            continue
        if t <= ts_budget:
            best = t
        else:
            if best == 0:
                best = t                 # smallest feasible chunk, over budget
            break
    return best if best else S


def _plan_tiles(B, S, D, P, x_isz, w_isz, o_isz, masked,
                block_batch=None, block_seq=None):
    cap = _vmem_capacity_bytes()
    target = (cap * 3) // 4              # leave headroom vs. physical VMEM

    TB = int(min(block_batch, B)) if block_batch else _choose_batch_tile(B)

    # Bytes that do not scale with the sequence tile.
    fixed = 2 * D * P * w_isz            # weight (grid-invariant, double-buffered)
    fixed += 2 * TB * P * o_isz          # output slab
    fixed += TB * D * 4                  # f32 accumulator scratch
    per_ts = 2 * TB * D * x_isz          # double-buffered activation tile, per seq row
    if masked:
        per_ts += 2 * TB * 4             # double-buffered lane-dense mask tile
    ts_budget = max(8, (target - fixed) // per_ts)

    if block_seq:
        TS = int(min(block_seq, S))
    else:
        TS = _choose_seq_tile(S, ts_budget)

    need = fixed + per_ts * TS + (4 << 20)          # + compiler headroom
    vmem_limit = int(min(cap, max(need, 32 << 20)))
    return TB, TS, vmem_limit


# ------------------------------------------------------------ pallas driver -

def _pool_call(x, m_scaled, weight_t, TB, TS, nb, vmem_limit, out_dtype):
    """Run the kernel over `nb` batch blocks of `TB` rows.  Only the first
    nb*TB rows of x / m_scaled are ever touched (no padding / copies needed)."""
    _, S, D = x.shape
    P = weight_t.shape[1]
    ns = S // TS

    x_spec = pl.BlockSpec((TB, TS, D), lambda b, s: (b, s, 0))
    w_spec = pl.BlockSpec((D, P), lambda b, s: (0, 0))     # constant: fetched once
    o_spec = pl.BlockSpec((1, TB, P), lambda b, s: (b, 0, 0))
    out_shape = jax.ShapeDtypeStruct((nb, TB, P), out_dtype)
    scratch = [pltpu.VMEM((TB, D), jnp.float32)]
    compiler_params = pltpu.CompilerParams(
        dimension_semantics=("parallel", "arbitrary"),
        vmem_limit_bytes=vmem_limit,
    )

    if m_scaled is None:
        kernel = functools.partial(_nomask_kernel, inv_s=1.0 / S)
        out = pl.pallas_call(
            kernel,
            out_shape=out_shape,
            grid_spec=pltpu.PrefetchScalarGridSpec(
                num_scalar_prefetch=0,
                grid=(nb, ns),
                in_specs=[x_spec, w_spec],
                out_specs=o_spec,
                scratch_shapes=scratch,
            ),
            compiler_params=compiler_params,
        )(x, weight_t)
    else:
        m_spec = pl.BlockSpec((TB, TS), lambda b, s: (b, s))
        out = pl.pallas_call(
            _masked_kernel,
            out_shape=out_shape,
            grid_spec=pltpu.PrefetchScalarGridSpec(
                num_scalar_prefetch=0,
                grid=(nb, ns),
                in_specs=[x_spec, m_spec, w_spec],
                out_specs=o_spec,
                scratch_shapes=scratch,
            ),
            compiler_params=compiler_params,
        )(x, m_scaled, weight_t)

    return out.reshape(nb * TB, P)


def mean_pooler(e_output, weight_t, e_mask=None, *, block_batch=None, block_seq=None):
    """e_output: [B, S, D]; weight_t: [D, P] (PyTorch linear.weight.T);
    e_mask: [B, 1, S] (1/0) or None."""
    B, S, D = e_output.shape
    P = weight_t.shape[1]
    x_isz = jnp.dtype(e_output.dtype).itemsize
    w_isz = jnp.dtype(weight_t.dtype).itemsize
    masked = e_mask is not None

    TB, TS, vmem_limit = _plan_tiles(B, S, D, P, x_isz, w_isz, x_isz, masked,
                                     block_batch, block_seq)
    if S % TS:
        TS = S                      # safety net for odd overrides

    m_scaled = None
    if masked:
        # Fold the per-row 1/denominator into the tiny lane-dense [B, S] mask
        # stream.  Fully-masked rows (denom == 0) yield NaN, same as PyTorch.
        src = e_mask.reshape(B, S).astype(jnp.float32)
        m_scaled = src / jnp.sum(src, axis=1, keepdims=True)

    nb_full = B // TB
    tail = B - nb_full * TB
    parts = []
    if nb_full:
        parts.append(_pool_call(e_output, m_scaled, weight_t, TB, TS, nb_full,
                                vmem_limit, e_output.dtype))
    if tail:
        # Tail rows get their own (tiny) call instead of materializing a padded
        # copy of the whole [B, S, D] activation tensor in HBM.
        x_t = e_output[nb_full * TB:]
        m_t = None if m_scaled is None else m_scaled[nb_full * TB:]
        parts.append(_pool_call(x_t, m_t, weight_t, tail, TS, 1,
                                vmem_limit, e_output.dtype))
    return parts[0] if len(parts) == 1 else jnp.concatenate(parts, axis=0)


# -------------------------------------------------------------- reference ---

def _reference(e_output, weight_t, e_mask=None):
    if e_mask is None:
        out = e_output.mean(axis=1)
    else:
        src = e_mask.reshape(e_output.shape[0], -1).astype(e_output.dtype)
        out = e_output / src.sum(axis=1)[:, None, None]
        out = (out * src[:, :, None]).sum(axis=1)
    return out @ weight_t


if __name__ == "__main__":
    key = jax.random.PRNGKey(0)
    k_x, k_w, k_x2, k_x3 = jax.random.split(key, 4)

    d_model, pooler_size = 32, 64
    w_torch = jax.random.normal(k_w, (pooler_size, d_model), dtype=jnp.float32) * 0.05
    weight_t = w_torch.T                                      # [d_model, pooler_size]

    # --- Test 1: small module-consistent shapes, single block, masked + unmasked
    B, S = 2, 8
    e_output = jax.random.normal(k_x, (B, S, d_model), dtype=jnp.float32)
    lengths = jnp.array([8, 5])
    e_mask = (jnp.arange(S)[None, :] < lengths[:, None]).astype(jnp.float32)[:, None, :]

    out_m = mean_pooler(e_output, weight_t, e_mask)
    jax.block_until_ready(out_m)
    assert out_m.shape == (B, pooler_size)
    assert jnp.allclose(out_m, _reference(e_output, weight_t, e_mask), rtol=1e-5, atol=1e-5)

    out_u = mean_pooler(e_output, weight_t, None)
    jax.block_until_ready(out_u)
    assert jnp.allclose(out_u, _reference(e_output, weight_t, None), rtol=1e-5, atol=1e-5)

    # --- Test 2: sequence-chunk accumulator (ns=2) + batch tail call (B=12, TB=8)
    B2, S2 = 12, 256
    e_output2 = jax.random.normal(k_x2, (B2, S2, d_model), dtype=jnp.float32)
    lengths2 = (jnp.arange(B2) * 17 % S2) + 1
    e_mask2 = (jnp.arange(S2)[None, :] < lengths2[:, None]).astype(jnp.float32)[:, None, :]

    out2 = mean_pooler(e_output2, weight_t, e_mask2, block_batch=8, block_seq=128)
    jax.block_until_ready(out2)
    assert out2.shape == (B2, pooler_size)
    assert jnp.allclose(out2, _reference(e_output2, weight_t, e_mask2), rtol=1e-5, atol=1e-5)

    # --- Test 3: default tile planning, multiple parallel batch blocks, unmasked
    B3, S3 = 16, 128
    e_output3 = jax.random.normal(k_x3, (B3, S3, d_model), dtype=jnp.float32)
    out3 = mean_pooler(e_output3, weight_t, None)
    jax.block_until_ready(out3)
    assert out3.shape == (B3, pooler_size)
    assert jnp.allclose(out3, _reference(e_output3, weight_t, None), rtol=1e-5, atol=1e-5)

    print("KERNEL_OK")
</pallas_src>

<mosaic_0001>
module attributes {stable_mosaic.version = 11 : i64} {
  func.func @_masked_kernel(%arg0: i32, %arg1: i32, %arg2: memref<2x8x32xf32, #tpu.memory_space<vmem>>, %arg3: memref<2x8xf32, #tpu.memory_space<vmem>>, %arg4: memref<32x64xf32, #tpu.memory_space<vmem>>, %arg5: memref<1x2x64xf32, #tpu.memory_space<vmem>>, %arg6: memref<2x32xf32, #tpu.memory_space<vmem>>) attributes {dimension_semantics = [#tpu.dimension_semantics<parallel>, #tpu.dimension_semantics<arbitrary>], iteration_bounds = array<i64: 1, 1>, scalar_prefetch = 0 : i64, scratch_operands = 1 : i64, tpu.core_type = #tpu.core_type<tc>, window_params = [{transform_indices = @transform_0, window_bounds = array<i64: 2, 8, 32>}, {transform_indices = @transform_1, window_bounds = array<i64: 2, 8>}, {pipeline_mode = #tpu.pipeline_mode<synchronous>, transform_indices = @transform_2, window_bounds = array<i64: 32, 64>}, {transform_indices = @transform_3, window_bounds = array<i64: 1, 2, 64>}]} {
    %c0_i32 = arith.constant 0 : i32
    %0 = arith.cmpi eq, %arg1, %c0_i32 : i32
    %1 = arith.extui %0 : i1 to i32
    %c0_i32_0 = arith.constant 0 : i32
    %2 = arith.cmpi ne, %1, %c0_i32_0 : i32
    scf.if %2 {
      %cst_11 = arith.constant 0.000000e+00 : f32
      %15 = vector.broadcast %cst_11 : f32 to vector<2x32xf32>
      %c0_12 = arith.constant 0 : index
      %c0_13 = arith.constant 0 : index
      %16 = vector.load %arg6[%c0_12, %c0_13] : memref<2x32xf32, #tpu.memory_space<vmem>>, vector<2x32xf32>
      tpu.vector_store %arg6[%c0_12, %c0_13], %15 {strides = array<i32>} : memref<2x32xf32, #tpu.memory_space<vmem>>, vector<2x32xf32>,
    } else {
    }
    %c0 = arith.constant 0 : index
    %c0_1 = arith.constant 0 : index
    %c0_2 = arith.constant 0 : index
    %3 = vector.load %arg2[%c0, %c0_1, %c0_2] : memref<2x8x32xf32, #tpu.memory_space<vmem>>, vector<2x8x32xf32>
    %c0_3 = arith.constant 0 : index
    %c0_4 = arith.constant 0 : index
    %4 = vector.load %arg3[%c0_3, %c0_4] : memref<2x8xf32, #tpu.memory_space<vmem>>, vector<2x8xf32>
    %c0_5 = arith.constant 0 : index
    %c0_6 = arith.constant 0 : index
    %5 = vector.load %arg6[%c0_5, %c0_6] : memref<2x32xf32, #tpu.memory_space<vmem>>, vector<2x32xf32>
    %6 = vector.shape_cast %4 : vector<2x8xf32> to vector<2x8x1xf32>
    %7 = vector.broadcast %6 : vector<2x8x1xf32> to vector<2x8x32xf32>
    %8 = arith.mulf %3, %7 : vector<2x8x32xf32>
    %cst = arith.constant dense<0.000000e+00> : vector<2x32xf32>
    %9 = vector.multi_reduction <add>, %8, %cst [1] : vector<2x8x32xf32> to vector<2x32xf32>
    %10 = arith.addf %5, %9 : vector<2x32xf32>
    %c0_7 = arith.constant 0 : index
    %c0_8 = arith.constant 0 : index
    %11 = vector.load %arg6[%c0_7, %c0_8] : memref<2x32xf32, #tpu.memory_space<vmem>>, vector<2x32xf32>
    tpu.vector_store %arg6[%c0_7, %c0_8], %10 {strides = array<i32>} : memref<2x32xf32, #tpu.memory_space<vmem>>, vector<2x32xf32>,
    %c0_i32_9 = arith.constant 0 : i32
    %12 = arith.cmpi eq, %arg1, %c0_i32_9 : i32
    %13 = arith.extui %12 : i1 to i32
    %c0_i32_10 = arith.constant 0 : i32
    %14 = arith.cmpi ne, %13, %c0_i32_10 : i32
    scf.if %14 {
      %c0_11 = arith.constant 0 : index
      %c0_12 = arith.constant 0 : index
      %15 = vector.load %arg6[%c0_11, %c0_12] : memref<2x32xf32, #tpu.memory_space<vmem>>, vector<2x32xf32>
      %c0_13 = arith.constant 0 : index
      %c0_14 = arith.constant 0 : index
      %16 = vector.load %arg4[%c0_13, %c0_14] : memref<32x64xf32, #tpu.memory_space<vmem>>, vector<32x64xf32>
      %cst_15 = arith.constant dense<0.000000e+00> : vector<2x64xf32>
      %17 = tpu.matmul %15, %16, %cst_15 {dimension_numbers = #tpu.dot_dimension_numbers<[1], [0], [0], [1], [0, 0, 1, 1], [], []>} : vector<2x32xf32>, vector<32x64xf32>, vector<2x64xf32> -> vector<2x64xf32>
      %c0_16 = arith.constant 0 : index
      %c0_17 = arith.constant 0 : index
      %c0_18 = arith.constant 0 : index
      %18 = vector.load %arg5[%c0_16, %c0_17, %c0_18] : memref<1x2x64xf32, #tpu.memory_space<vmem>>, vector<1x2x64xf32>
      %19 = vector.shape_cast %18 : vector<1x2x64xf32> to vector<2x64xf32>
      %20 = vector.shape_cast %17 : vector<2x64xf32> to vector<1x2x64xf32>
      tpu.vector_store %arg5[%c0_16, %c0_17, %c0_18], %20 {strides = array<i32>} : memref<1x2x64xf32, #tpu.memory_space<vmem>>, vector<1x2x64xf32>,
    } else {
    }
    return
  }
  func.func @transform_0(%arg0: i32, %arg1: i32) -> (i32, i32, i32) {
    %c0_i32 = arith.constant 0 : i32
    %c0_i32_0 = arith.constant 0 : i32
    return %arg0, %arg1, %c0_i32 : i32, i32, i32
  }
  func.func @transform_1(%arg0: i32, %arg1: i32) -> (i32, i32) {
    %c0_i32 = arith.constant 0 : i32
    return %arg0, %arg1 : i32, i32
  }
  func.func @transform_2(%arg0: i32, %arg1: i32) -> (i32, i32) {
    %c0_i32 = arith.constant 0 : i32
    %c0_i32_0 = arith.constant 0 : i32
    %c0_i32_1 = arith.constant 0 : i32
    return %c0_i32, %c0_i32_0 : i32, i32
  }
  func.func @transform_3(%arg0: i32, %arg1: i32) -> (i32, i32, i32) {
    %c0_i32 = arith.constant 0 : i32
    %c0_i32_0 = arith.constant 0 : i32
    %c0_i32_1 = arith.constant 0 : i32
    return %arg0, %c0_i32, %c0_i32_0 : i32, i32, i32
  }
}

</mosaic_0001>

<bundles_post_ra>
// kernel: tpu_custom_call.1
= control target key start
LH: loop header
LB: loop body
LE: loop exit
PB: predicated region body
PF: predicated region fallthrough
CT: control target
= control target key end

     0   :  { %8 = vsyncpa [#allocation4], 0  ;;  %s358_s0 = inlined_call_operand.hbm [shape: f32[2,8,32], index: 0, kind: input, shape index: {}]   ;;  %s359_s1 = inlined_call_operand.hbm [shape: f32[2,8], index: 1, kind: input, shape index: {}]   ;;  %s360_s2 = inlined_call_operand.hbm [shape: f32[32,64], index: 2, kind: input, shape index: {}]   ;;  %s361_s3 = inlined_call_operand.hbm [shape: f32[1,2,64], index: 3, kind: output, shape index: {}]  }
   0x1   :  { %9 = vsyncpa [#allocation7], 0 }
   0x2   :  { %10 = vsyncpa [#allocation5], 0  ;;  %s313_s12 = smov [#allocation6]   ;;  %s314_s14 = smov [#allocation3]  }
   0x3   :  { %s29_s13 = sshll.u32 %s313_s12, 4  ;;  %s16_s15 = sshll.u32 %s314_s14, 4  ;;  %s30_s13 = int_to_ptr.vmem [resolvable:$true] %s29_s13  ;;  %s17_s15 = int_to_ptr.vmem [resolvable:$true] %s16_s15 }
   0x4   :  { %s235_s16 = scalar_lea.vmem %s30_s13, 32  ;;  %p240_p1 = scmp.lt.s32.totalorder %s30_s13, %s30_s13 }
   0x5   :  { %p236_p0 = scmp.ne.s32.totalorder %s30_s13, %s235_s16  ;;  %p241_p2 = scmp.lt.s32.totalorder %s235_s16, %s235_s16 }
   0x7   :  { %p242_p3 = por %p241_p2, %p240_p1 }
   0x9   :  { %p243_p4 = pnand %p242_p3, %p236_p0 }
   0xb   :  { %246 = shalt.err (!%p243_p4)
}
   0xc   :  { %32 = dma.hbm_to_vmem [thread:$0]  %s359_s1, 32, %s30_s13, [#allocation7]  }
   0xd   :  { %s255_s19 = scalar_lea.vmem %s17_s15, 256  ;;  %p260_p6 = scmp.lt.s32.totalorder %s17_s15, %s17_s15 }
   0xe   :  { %p256_p5 = scmp.ne.s32.totalorder %s17_s15, %s255_s19  ;;  %p261_p7 = scmp.lt.s32.totalorder %s255_s19, %s255_s19 }
  0x10   :  { %p262_p8 = por %p261_p7, %p260_p6 }
  0x12   :  { %p263_p9 = pnand %p262_p8, %p256_p5 }
  0x14   :  { %266 = shalt.err (!%p263_p9)
}
  0x15   :  { %s315_s20 = smov 128   ;;  %s316_s21 = smov 8  }
  0x16   :  { %22 = dma.hbm_to_vmem [thread:$0]  %s358_s0, 256, %s17_s15, [#allocation4], %s315_s20, %s315_s20, %s316_s21  }
  0x17   :  { %s317_s24 = smov [#allocation8]  }
  0x18   :  { %s38_s25 = sshll.u32 %s317_s24, 4  ;;  %s39_s25 = int_to_ptr.vmem [resolvable:$true] %s38_s25 }
  0x19   :  { %s275_s26 = scalar_lea.vmem %s39_s25, 512  ;;  %p280_p11 = scmp.lt.s32.totalorder %s39_s25, %s39_s25 }
  0x1a   :  { %p276_p10 = scmp.ne.s32.totalorder %s39_s25, %s275_s26  ;;  %p281_p12 = scmp.lt.s32.totalorder %s275_s26, %s275_s26 }
  0x1c   :  { %p282_p13 = por %p281_p12, %p280_p11 }
  0x1e   :  { %p283_p0 = pnand %p282_p13, %p276_p10 }
  0x20   :  { %286 = shalt.err (!%p283_p0)
}
  0x21   :  { %44 = dma.hbm_to_vmem [thread:$0]  %s360_s2, 512, %s39_s25, [#allocation7], %s315_s20, %s315_s20, %s316_s21  }
  0x22   :  { %307 = dma.done.wait [#allocation4], 256  }
  0x23   :  { %308 = vsyncadd [#allocation4], 4294967040 }
  0x24   :  { %309 = dma.done.wait [#allocation7], 544  }
  0x25   :  { %310 = vsyncadd [#allocation7], 4294966752  ;;  %v64_v0 = vlaneseq  ;;  %v62_v4 = vld [vmem:[#allocation6] sm:$0x3]  ;;  %vm58_vm0 = vcmask 254976   ;;  %v318_v6 = vmov 0.0  }
  0x26   :  { %59 = vst.msk [vmem:[#allocation2] sm:$0x3] %vm58_vm0, %v318_v6  ;;  %208 = vmatprep.subr.mxu0 %v318_v6  ;;  %v110_v8 = vld [vmem:[#allocation8 + $0x18] sm:$0xff]  ;;  %v109_v9 = vld [vmem:[#allocation8 + $0x10] sm:$0xff]  ;;  %vm319_vm1 = vmmov 0   ;;  %v108_v10 = vld [vmem:[#allocation8 + $0x8] sm:$0xff] }
  0x27   :  { %v65_v1 = vshrl.u32 %v64_v0, 7  ;;  %209 = vmatpush3.msra.mxu0 %v110_v8  ;;  %216 = vmatprep.mubr.msk.f32.mxu0 %vm319_vm1, %v318_v6  ;;  %v107_v11 = vld [vmem:[#allocation8] sm:$0xff]  ;;  %v60_v12 = vld [vmem:[#allocation3] sm:$0xff]  ;;  %vm80_vm2 = vcmask 261120   ;;  %v61_v15 = vld [vmem:[#allocation3 + $0x8] sm:$0xff]  ;;  %vm97_vm3 = vcmask 1041409  }
  0x28   :  { %210 = vmatprep.subr.mxu0 %v318_v6  ;;  %s320_s0 = smov [#allocation9]   ;;  %vm184_vm4 = vcmask 517120  }
  0x29   :  { %v66_v2 = vsub.s32 0, %v65_v1  ;;  %v73_v3 = vsub.s32 1, %v65_v1  ;;  %211 = vmatpush3.msra.mxu0 %v109_v9  ;;  %s192_s2 = sshll.u32 %s320_s0, 4  ;;  %s193_s2 = int_to_ptr.vmem [resolvable:$true] %s192_s2 }
  0x2a   :  { %212 = vmatprep.subr.mxu0 %v318_v6  ;;  %s287_s28 = scalar_lea.vmem %s193_s2, 32  ;;  %p292_p2 = scmp.lt.s32.totalorder %s193_s2, %s193_s2 }
  0x2b   :  { %v67_v5 = vrot.slane %v62_v4, %v66_v2  ;;  %v74_v7 = vrot.slane %v62_v4, %v73_v3  ;;  %213 = vmatpush3.msra.mxu0 %v108_v10  ;;  %p288_p1 = scmp.ne.s32.totalorder %s193_s2, %s287_s28  ;;  %p293_p3 = scmp.lt.s32.totalorder %s287_s28, %s287_s28 }
  0x2c   :  { %214 = vmatprep.subr.mxu0 %v318_v6 }
  0x2d   :  { %69 = vbcast.lane.b32.xlu0 %v67_v5, 256  ;;  %215 = vmatpush3.msra.mxu0 %v107_v11  ;;  %v63_v32 = vld [vmem:[#allocation2] sm:$0x3]  ;;  %p294_p4 = por %p293_p3, %p292_p2 }
  0x2f   :  { %p295_p5 = pnand %p294_p4, %p288_p1 }
  0x31   :  { %76 = vbcast.lane.b32.xlu0 %v74_v7, 256 }
  0x9f   :  { %v70_v13 = vpop.permute.xlu0 %69 }
  0xa0   :  { %v78_v14 = vmul.f32 %v70_v13, %v60_v12 }
  0xa2   :  { %v81_v16 = vsel %vm80_vm2, %v78_v14, 0.0 }
  0xa3   :  { %v82_v17 = vrot.slane %v81_v16, 4  ;;  %v77_v18 = vpop.permute.xlu0 %76 }
  0xa4   :  { %v79_v19 = vmul.f32 %v77_v18, %v61_v15 }
  0xa5   :  { %v83_v20 = vadd.f32 %v82_v17, %v81_v16 }
  0xa6   :  { %v88_v21 = vsel %vm80_vm2, %v79_v19, 0.0 }
  0xa7   :  { %v84_v22 = vrot.slane %v83_v20, 2  ;;  %v89_v23 = vrot.slane %v88_v21, 4 }
  0xa9   :  { %v85_v24 = vadd.f32 %v84_v22, %v83_v20  ;;  %v90_v25 = vadd.f32 %v89_v23, %v88_v21 }
  0xab   :  { %v91_v26 = vrot.slane %v90_v25, 2  ;;  %v86_v27 = vrot.slane %v85_v24, 1 }
  0xad   :  { %v92_v28 = vadd.f32 %v91_v26, %v90_v25  ;;  %v87_v30 = vadd.f32 %v86_v27, %v85_v24 }
  0xaf   :  { %v93_v29 = vrot.slane %v92_v28, 1 }
  0xb1   :  { %v94_v31 = vadd.f32 %v93_v29, %v92_v28 }
  0xb3   :  { %v98_v33 = vsel %vm97_vm3, %v94_v31, %v87_v30 }
  0xb4   :  { %v100_v34 = vadd.f32 %v98_v33, %v63_v32 }
  0xb6   :  { %102 = vst.msk [vmem:[#allocation2] sm:$0x3] %vm58_vm0, %v100_v34 }
  0xbd   :  { %v106_v35 = vld [vmem:[#allocation2] sm:$0x3] }
  0xbe   :  { %217 = vmatmul.mubr.msk.f32.vlgmr.msra.gmra.mxu0 %vm80_vm2, %v106_v35 }
 0x17e   :  { %v180_v36 = vpop.f32.mrf.mxu0 }
 0x17f   :  { %185 = vst.msk [vmem:[#allocation9] sm:$0x3] %vm184_vm4, %v180_v36 }
 0x180   :  { %v218_v37 = vpop.f32.mrf.mxu0 }
 0x181   :  { %298 = shalt.err (!%p295_p5)
}
 0x182   :  { %195 = dma.vmem_to_hbm [thread:$0]  %s193_s2, 32, %s361_s3, [#allocation5]  }
 0x183   :  { %311 = dma.done.wait [#allocation5], 32  }
 0x184   :  { %312 = vsyncadd [#allocation5], 4294967264 }
 0x185   :  { %199 = vsyncpa [#allocation4], 1 }
 0x186   :  { %200 = vsyncpa [#allocation7], 1 }
 0x187   :  { %201 = vsyncpa [#allocation5], 1 }

</bundles_post_ra>
